<compile_context>
chip_gen: v7x
topology: tpu7x:2x2x1
jax: 0.10.0
libtpu: 0.0.40
codegen_flags: <defaults>
</compile_context>

<pallas_src>
import math

import jax
import jax.numpy as jnp
from jax.experimental import pallas as pl
from jax.experimental.pallas import tpu as pltpu


def _mlp_kernel(x_ref, w1_ref, b1_ref, w2_ref, b2_ref, o_ref):
    # Cast x f32 -> bf16 on the VPU inside the kernel (hidden under DMA),
    # then layer 1 on the MXU with f32 accumulation, f32 bias, ReLU.
    x = x_ref[...].astype(jnp.bfloat16)
    h = jnp.dot(x, w1_ref[...], preferred_element_type=jnp.float32)
    h = jnp.maximum(h + b1_ref[...], 0.0)
    # Layer 2: hidden stays resident in VMEM/vregs (never written to HBM);
    # feed the MXU in bf16, accumulate f32, bias + ReLU, store in o_ref dtype.
    y = jnp.dot(h.astype(jnp.bfloat16), w2_ref[...],
                preferred_element_type=jnp.float32)
    o_ref[...] = jnp.maximum(y + b2_ref[...], 0.0).astype(o_ref.dtype)


def _round_up(n, m):
    return -(-n // m) * m


# Hard cap on rows per batch tile: keeps per-tile VMEM (double-buffered x/out
# + pinned weights + f32 hidden) well under v5e's 16 MiB scoped default.
_MAX_TILE_ROWS = 512
_ROW_ALIGN = 16  # bf16 sublane packing; also a multiple of the f32 sublane (8)


def _choose_tiling(batch, block_b):
    """Smallest number of tiles with tm <= cap; tm multiple of 16; minimal pad."""
    cap = max(_ROW_ALIGN, min(_round_up(block_b, _ROW_ALIGN), _MAX_TILE_ROWS))
    b_aligned = _round_up(max(batch, 1), _ROW_ALIGN)
    n_tiles = pl.cdiv(b_aligned, cap)
    tm = _round_up(-(-b_aligned // n_tiles), _ROW_ALIGN)
    return tm, n_tiles, tm * n_tiles


def linear_model_forward(x, w1, b1, w2, b2, *, block_b=512,
                         out_dtype=jnp.bfloat16):
    """x: [B, in_f] float, w1: [in_f, H1] bf16, b1: [1, H1] f32,
    w2: [H1, H2] bf16, b2: [1, H2] f32. Returns [B, H2] in out_dtype."""
    B, in_f = x.shape
    H1 = w1.shape[1]
    H2 = w2.shape[1]

    # Keep x in f32 in HBM; the bf16 cast happens inside the kernel.
    x = x.astype(jnp.float32)

    tm, n_tiles, B_pad = _choose_tiling(B, block_b)
    if B_pad != B:
        x = jnp.pad(x, ((0, B_pad - B), (0, 0)))

    out_itemsize = jnp.dtype(out_dtype).itemsize
    weight_bytes = (in_f * H1 + H1 * H2) * 2 + (H1 + H2) * 4   # bf16 W, f32 b
    batch_bytes = B_pad * in_f * 4 + B_pad * H2 * out_itemsize  # x f32 + out

    # Megacore split (v7x) only when batch traffic dominates the pinned weights
    # that each core would re-fetch; otherwise keep the grid on one core.
    if n_tiles > 1 and batch_bytes > weight_bytes:
        semantics = ("parallel",)
    else:
        semantics = ("arbitrary",)

    flops = 2 * B_pad * (in_f * H1 + H1 * H2)
    bytes_accessed = batch_bytes + weight_bytes

    out = pl.pallas_call(
        _mlp_kernel,
        out_shape=jax.ShapeDtypeStruct((B_pad, H2), out_dtype),
        grid=(n_tiles,),
        in_specs=[
            pl.BlockSpec((tm, in_f), lambda i: (i, 0)),
            # Weights/biases pinned at block (0,0): DMA'd once, reused across
            # all batch tiles of the call.
            pl.BlockSpec((in_f, H1), lambda i: (0, 0)),
            pl.BlockSpec((1, H1), lambda i: (0, 0)),
            pl.BlockSpec((H1, H2), lambda i: (0, 0)),
            pl.BlockSpec((1, H2), lambda i: (0, 0)),
        ],
        out_specs=pl.BlockSpec((tm, H2), lambda i: (i, 0)),
        compiler_params=pltpu.CompilerParams(
            dimension_semantics=semantics,
            vmem_limit_bytes=32 * 1024 * 1024,  # safe on v5e/v6e/v7x at tm<=512
        ),
        cost_estimate=pl.CostEstimate(
            flops=flops, transcendentals=0, bytes_accessed=bytes_accessed),
    )(x, w1, b1, w2, b2)
    return out[:B]


def init_linear_params(key, in_f, out_f):
    """Deterministic init mimicking nn.Linear: U(-1/sqrt(in), 1/sqrt(in)).
    Weight returned in [in_f, out_f] layout (transposed vs. PyTorch), bf16;
    bias as [1, out_f] f32."""
    kw, kb = jax.random.split(key)
    bound = 1.0 / math.sqrt(in_f)
    w = jax.random.uniform(kw, (in_f, out_f), jnp.float32, -bound, bound)
    b = jax.random.uniform(kb, (1, out_f), jnp.float32, -bound, bound)
    return w.astype(jnp.bfloat16), b


def _reference(x, w1, b1, w2, b2, out_dtype=jnp.bfloat16):
    # Pure-JAX reference with the same rounding points as the kernel
    # (bf16 inputs to each matmul, f32 accumulation, out_dtype store).
    xf = x.astype(jnp.bfloat16).astype(jnp.float32)
    w1f = w1.astype(jnp.float32)
    w2f = w2.astype(jnp.float32)
    h = jnp.maximum(xf @ w1f + b1, 0.0)
    h = h.astype(jnp.bfloat16).astype(jnp.float32)
    y = jnp.maximum(h @ w2f + b2, 0.0)
    return y.astype(out_dtype)


if __name__ == "__main__":
    # Module-implied sizes: in_features -> 1024 -> 512 (out_features default).
    B = 2
    IN_FEATURES = 32
    HIDDEN = 1024
    OUT_FEATURES = 512

    key = jax.random.PRNGKey(0)
    k_x, k_l1, k_l2, k_big = jax.random.split(key, 4)

    w1, b1 = init_linear_params(k_l1, IN_FEATURES, HIDDEN)
    w2, b2 = init_linear_params(k_l2, HIDDEN, OUT_FEATURES)

    # TODO(synk): noisy (NoisyLinear) and cat_in_features>0 paths not exercised;
    # default LinearModel config (args.noisy=False, cat_in_features=0) implemented.

    # Small batch, default bf16 output (weight-dominated -> single-core grid).
    x = jax.random.normal(k_x, (B, IN_FEATURES), jnp.float32)
    out = jax.block_until_ready(linear_model_forward(x, w1, b1, w2, b2))
    ref = _reference(x, w1, b1, w2, b2)
    assert out.shape == (B, OUT_FEATURES) and out.dtype == jnp.bfloat16
    assert jnp.allclose(out.astype(jnp.float32), ref.astype(jnp.float32),
                        atol=2e-2, rtol=2e-2)

    # Larger batch: 2 unpadded tiles of 320 rows, f32 output, batch-dominated
    # traffic -> "parallel" grid (megacore on v7x, no-op on v5e/v6e).
    Bb = 640
    xb = jax.random.normal(k_big, (Bb, IN_FEATURES), jnp.float32)
    outb = jax.block_until_ready(
        linear_model_forward(xb, w1, b1, w2, b2, out_dtype=jnp.float32))
    refb = _reference(xb, w1, b1, w2, b2, out_dtype=jnp.float32)
    assert outb.shape == (Bb, OUT_FEATURES) and outb.dtype == jnp.float32
    assert jnp.allclose(outb, refb, atol=2e-2, rtol=2e-2)

    print("KERNEL_OK")
</pallas_src>

<mosaic_0001>
module attributes {stable_mosaic.version = 11 : i64} {
  func.func @_mlp_kernel(%arg0: i32, %arg1: memref<16x32xf32, #tpu.memory_space<vmem>>, %arg2: memref<32x1024xbf16, #tpu.memory_space<vmem>>, %arg3: memref<1x1024xf32, #tpu.memory_space<vmem>>, %arg4: memref<1024x512xbf16, #tpu.memory_space<vmem>>, %arg5: memref<1x512xf32, #tpu.memory_space<vmem>>, %arg6: memref<16x512xbf16, #tpu.memory_space<vmem>>) attributes {dimension_semantics = [#tpu.dimension_semantics<arbitrary>], iteration_bounds = array<i64: 1>, scalar_prefetch = 0 : i64, scratch_operands = 0 : i64, tpu.core_type = #tpu.core_type<tc>, window_params = [{transform_indices = @transform_0, window_bounds = array<i64: 16, 32>}, {pipeline_mode = #tpu.pipeline_mode<synchronous>, transform_indices = @transform_1, window_bounds = array<i64: 32, 1024>}, {pipeline_mode = #tpu.pipeline_mode<synchronous>, transform_indices = @transform_2, window_bounds = array<i64: 1, 1024>}, {pipeline_mode = #tpu.pipeline_mode<synchronous>, transform_indices = @transform_3, window_bounds = array<i64: 1024, 512>}, {pipeline_mode = #tpu.pipeline_mode<synchronous>, transform_indices = @transform_4, window_bounds = array<i64: 1, 512>}, {transform_indices = @transform_5, window_bounds = array<i64: 16, 512>}]} {
    %c0 = arith.constant 0 : index
    %c0_0 = arith.constant 0 : index
    %0 = vector.load %arg1[%c0, %c0_0] : memref<16x32xf32, #tpu.memory_space<vmem>>, vector<16x32xf32>
    %1 = arith.truncf %0 : vector<16x32xf32> to vector<16x32xbf16>
    %c0_1 = arith.constant 0 : index
    %c0_2 = arith.constant 0 : index
    %2 = vector.load %arg2[%c0_1, %c0_2] : memref<32x1024xbf16, #tpu.memory_space<vmem>>, vector<32x1024xbf16>
    %cst = arith.constant dense<0.000000e+00> : vector<16x1024xf32>
    %3 = tpu.matmul %1, %2, %cst {dimension_numbers = #tpu.dot_dimension_numbers<[1], [0], [0], [1], [0, 0, 1, 1], [], []>} : vector<16x32xbf16>, vector<32x1024xbf16>, vector<16x1024xf32> -> vector<16x1024xf32>
    %c0_3 = arith.constant 0 : index
    %c0_4 = arith.constant 0 : index
    %4 = vector.load %arg3[%c0_3, %c0_4] : memref<1x1024xf32, #tpu.memory_space<vmem>>, vector<1x1024xf32>
    %5 = vector.broadcast %4 : vector<1x1024xf32> to vector<16x1024xf32>
    %6 = arith.addf %3, %5 : vector<16x1024xf32>
    %cst_5 = arith.constant 0.000000e+00 : f32
    %7 = vector.broadcast %cst_5 : f32 to vector<16x1024xf32>
    %8 = arith.maximumf %6, %7 : vector<16x1024xf32>
    %9 = arith.truncf %8 : vector<16x1024xf32> to vector<16x1024xbf16>
    %c0_6 = arith.constant 0 : index
    %c0_7 = arith.constant 0 : index
    %10 = vector.load %arg4[%c0_6, %c0_7] : memref<1024x512xbf16, #tpu.memory_space<vmem>>, vector<1024x512xbf16>
    %cst_8 = arith.constant dense<0.000000e+00> : vector<16x512xf32>
    %11 = tpu.matmul %9, %10, %cst_8 {dimension_numbers = #tpu.dot_dimension_numbers<[1], [0], [0], [1], [0, 0, 1, 1], [], []>} : vector<16x1024xbf16>, vector<1024x512xbf16>, vector<16x512xf32> -> vector<16x512xf32>
    %c0_9 = arith.constant 0 : index
    %c0_10 = arith.constant 0 : index
    %12 = vector.load %arg5[%c0_9, %c0_10] : memref<1x512xf32, #tpu.memory_space<vmem>>, vector<1x512xf32>
    %13 = vector.broadcast %12 : vector<1x512xf32> to vector<16x512xf32>
    %14 = arith.addf %11, %13 : vector<16x512xf32>
    %cst_11 = arith.constant 0.000000e+00 : f32
    %15 = vector.broadcast %cst_11 : f32 to vector<16x512xf32>
    %16 = arith.maximumf %14, %15 : vector<16x512xf32>
    %17 = arith.truncf %16 : vector<16x512xf32> to vector<16x512xbf16>
    %c0_12 = arith.constant 0 : index
    %c0_13 = arith.constant 0 : index
    %18 = vector.load %arg6[%c0_12, %c0_13] : memref<16x512xbf16, #tpu.memory_space<vmem>>, vector<16x512xbf16>
    tpu.vector_store %arg6[%c0_12, %c0_13], %17 {strides = array<i32>} : memref<16x512xbf16, #tpu.memory_space<vmem>>, vector<16x512xbf16>,
    return
  }
  func.func @transform_0(%arg0: i32) -> (i32, i32) {
    %c0_i32 = arith.constant 0 : i32
    %c0_i32_0 = arith.constant 0 : i32
    return %arg0, %c0_i32 : i32, i32
  }
  func.func @transform_1(%arg0: i32) -> (i32, i32) {
    %c0_i32 = arith.constant 0 : i32
    %c0_i32_0 = arith.constant 0 : i32
    %c0_i32_1 = arith.constant 0 : i32
    return %c0_i32, %c0_i32_0 : i32, i32
  }
  func.func @transform_2(%arg0: i32) -> (i32, i32) {
    %c0_i32 = arith.constant 0 : i32
    %c0_i32_0 = arith.constant 0 : i32
    %c0_i32_1 = arith.constant 0 : i32
    return %c0_i32, %c0_i32_0 : i32, i32
  }
  func.func @transform_3(%arg0: i32) -> (i32, i32) {
    %c0_i32 = arith.constant 0 : i32
    %c0_i32_0 = arith.constant 0 : i32
    %c0_i32_1 = arith.constant 0 : i32
    return %c0_i32, %c0_i32_0 : i32, i32
  }
  func.func @transform_4(%arg0: i32) -> (i32, i32) {
    %c0_i32 = arith.constant 0 : i32
    %c0_i32_0 = arith.constant 0 : i32
    %c0_i32_1 = arith.constant 0 : i32
    return %c0_i32, %c0_i32_0 : i32, i32
  }
  func.func @transform_5(%arg0: i32) -> (i32, i32) {
    %c0_i32 = arith.constant 0 : i32
    %c0_i32_0 = arith.constant 0 : i32
    return %arg0, %c0_i32 : i32, i32
  }
}

</mosaic_0001>

<bundles_post_ra>
// kernel: tpu_custom_call.1
= control target key start
LH: loop header
LB: loop body
LE: loop exit
PB: predicated region body
PF: predicated region fallthrough
CT: control target
= control target key end

     0   :  { %10 = vsyncpa [#allocation3], 0  ;;  %s3381_s0 = inlined_call_operand.hbm [shape: f32[16,32], index: 0, kind: input, shape index: {}]   ;;  %s3382_s1 = inlined_call_operand.hbm [shape: bf16[32,1024], index: 1, kind: input, shape index: {}]   ;;  %s3383_s2 = inlined_call_operand.hbm [shape: f32[1,1024], index: 2, kind: input, shape index: {}]   ;;  %s3384_s3 = inlined_call_operand.hbm [shape: bf16[1024,512], index: 3, kind: input, shape index: {}]   ;;  %s3385_s4 = inlined_call_operand.vmem [shape: f32[1,512], index: 4, kind: input, shape index: {}]   ;;  %s3386_s5 = inlined_call_operand.hbm [shape: bf16[16,512], index: 5, kind: output, shape index: {}]  }
   0x1   :  { %11 = vsyncpa [#allocation6], 0 }
   0x2   :  { %12 = vsyncpa [#allocation9], 0 }
   0x3   :  { %13 = vsyncpa [#allocation4], 0  ;;  %s3203_s18 = smov [#allocation5]   ;;  %s3085_s22 = scalar_lea.hbm %s3382_s1, 2048 }
   0x4   :  { %s31_s19 = sshll.u32 %s3203_s18, 4  ;;  %p3086_p0 = scmp.ne.s32.totalorder %s3382_s1, %s3085_s22  ;;  %s32_s19 = int_to_ptr.vmem [resolvable:$true] %s31_s19 }
   0x5   :  { %p3089_p1 = scmp.lt.u32.totalorder %s3085_s22, %s3382_s1 }
   0x7   :  { %p3091_p2 = pnand %p3089_p1, %p3086_p0 }
   0x9   :  { %3094 = shalt.err (!%p3091_p2)
}
   0xa   :  { %s3095_s27 = scalar_lea.vmem %s32_s19, 2048  ;;  %p3100_p4 = scmp.lt.s32.totalorder %s32_s19, %s32_s19 }
   0xb   :  { %p3096_p3 = scmp.ne.s32.totalorder %s32_s19, %s3095_s27  ;;  %p3101_p5 = scmp.lt.s32.totalorder %s3095_s27, %s3095_s27 }
   0xd   :  { %p3102_p6 = por %p3101_p5, %p3100_p4 }
   0xf   :  { %p3103_p7 = pnand %p3102_p6, %p3096_p3 }
  0x11   :  { %3106 = shalt.err (!%p3103_p7)
}
  0x12   :  { %s3204_s28 = smov 512   ;;  %s3205_s29 = smov 32  }
  0x13   :  { %37 = dma.hbm_to_vmem [thread:$0]  %s3382_s1, 2048, %s32_s19, [#allocation6], %s3204_s28, %s3204_s28, %s3205_s29  }
  0x14   :  { %s3206_s7 = smov [#allocation2]   ;;  %s3107_s11 = scalar_lea.hbm %s3381_s0, 256 }
  0x15   :  { %s19_s8 = sshll.u32 %s3206_s7, 4  ;;  %p3108_p8 = scmp.ne.s32.totalorder %s3381_s0, %s3107_s11  ;;  %s20_s8 = int_to_ptr.vmem [resolvable:$true] %s19_s8 }
  0x16   :  { %p3111_p9 = scmp.lt.u32.totalorder %s3107_s11, %s3381_s0 }
  0x18   :  { %p3113_p10 = pnand %p3111_p9, %p3108_p8 }
  0x1a   :  { %3116 = shalt.err (!%p3113_p10)
}
  0x1b   :  { %s3117_s16 = scalar_lea.vmem %s20_s8, 256  ;;  %p3122_p12 = scmp.lt.s32.totalorder %s20_s8, %s20_s8 }
  0x1c   :  { %p3118_p11 = scmp.ne.s32.totalorder %s20_s8, %s3117_s16  ;;  %p3123_p13 = scmp.lt.s32.totalorder %s3117_s16, %s3117_s16 }
  0x1e   :  { %p3124_p0 = por %p3123_p13, %p3122_p12 }
  0x20   :  { %p3125_p1 = pnand %p3124_p0, %p3118_p11 }
  0x22   :  { %3128 = shalt.err (!%p3125_p1)
}
  0x23   :  { %s3207_s1 = smov 128   ;;  %s3208_s17 = smov 8  }
  0x24   :  { %25 = dma.hbm_to_vmem [thread:$0]  %s3381_s0, 256, %s20_s8, [#allocation3], %s3207_s1, %s3207_s1, %s3208_s17  }
  0x25   :  { %s3209_s20 = smov [#allocation7]   ;;  %s3210_s22 = smov [#allocation8]  }
  0x26   :  { %s44_s21 = sshll.u32 %s3209_s20, 4  ;;  %s53_s23 = sshll.u32 %s3210_s22, 4  ;;  %s45_s21 = int_to_ptr.vmem [resolvable:$true] %s44_s21  ;;  %s3269_s23 = int_to_ptr.vmem [resolvable:$true] %s53_s23 }
  0x27   :  { %s3129_s26 = scalar_lea.hbm %s3383_s2, 128 }
  0x28   :  { %p3130_p2 = scmp.ne.s32.totalorder %s3383_s2, %s3129_s26  ;;  %p3133_p3 = scmp.lt.u32.totalorder %s3129_s26, %s3383_s2 }
  0x2a   :  { %p3135_p4 = pnand %p3133_p3, %p3130_p2 }
  0x2c   :  { %3138 = shalt.err (!%p3135_p4)
}
  0x2d   :  { %s3139_s0 = scalar_lea.vmem %s45_s21, 128  ;;  %p3144_p6 = scmp.lt.s32.totalorder %s45_s21, %s45_s21 }
  0x2e   :  { %p3140_p5 = scmp.ne.s32.totalorder %s45_s21, %s3139_s0  ;;  %p3145_p7 = scmp.lt.s32.totalorder %s3139_s0, %s3139_s0 }
  0x30   :  { %p3146_p8 = por %p3145_p7, %p3144_p6 }
  0x32   :  { %p3147_p9 = pnand %p3146_p8, %p3140_p5 }
  0x34   :  { %3150 = shalt.err (!%p3147_p9)
}
  0x35   :  { %47 = dma.hbm_to_vmem [thread:$0]  %s3383_s2, 128, %s45_s21, [#allocation6]  }
  0x36   :  { %s3151_s10 = scalar_lea.hbm %s3384_s3, 32768 }
  0x37   :  { %p3152_p10 = scmp.ne.s32.totalorder %s3384_s3, %s3151_s10  ;;  %p3155_p11 = scmp.lt.u32.totalorder %s3151_s10, %s3384_s3 }
  0x39   :  { %p3157_p12 = pnand %p3155_p11, %p3152_p10 }
  0x3b   :  { %3160 = shalt.err (!%p3157_p12)
}
  0x3c   :  { %s3161_s15 = scalar_lea.vmem %s3269_s23, 32768  ;;  %p3166_p0 = scmp.lt.s32.totalorder %s3269_s23, %s3269_s23 }
  0x3d   :  { %p3162_p13 = scmp.ne.s32.totalorder %s3269_s23, %s3161_s15  ;;  %p3167_p1 = scmp.lt.s32.totalorder %s3161_s15, %s3161_s15 }
  0x3f   :  { %p3168_p2 = por %p3167_p1, %p3166_p0 }
  0x41   :  { %p3169_p3 = pnand %p3168_p2, %p3162_p13 }
  0x43   :  { %3172 = shalt.err (!%p3169_p3)
}
  0x44   :  { %s3211_s2 = smov 256   ;;  %s3212_s16 = smov 16  }
  0x45   :  { %59 = dma.hbm_to_vmem [thread:$0]  %s3384_s3, 32768, %s3269_s23, [#allocation9], %s3211_s2, %s3211_s2, %s3212_s16  }
  0x46   :  { %3195 = dma.done.wait [#allocation3], 256  }
  0x47   :  { %3196 = vsyncadd [#allocation3], 4294967040 }
  0x48   :  { %3197 = dma.done.wait [#allocation6], 2176  }
  0x49   :  { %3198 = vsyncadd [#allocation6], 4294965120 }
  0x4a   :  { %3199 = dma.done.wait [#allocation9], 32768  }
  0x4b   :  { %3200 = vsyncadd [#allocation9], 4294934528  ;;  %v3213_v0 = vmov 0   ;;  %v78_v1 = vld [vmem:[#allocation5] sm:$0xff]  ;;  %v79_v8 = vld [vmem:[#allocation5 + $0x8] sm:$0xff]  ;;  %vm216_vm0 = vcmask 261120  }
  0x4c   :  { %252 = vmatprep.mubr.bf16.mxu0 %v3213_v0  ;;  %295 = vmatprep.mubr.bf16.mxu1 %v3213_v0  ;;  %v82_v2 = vld [vmem:[#allocation5 + $0x20] sm:$0xff]  ;;  %v83_v9 = vld [vmem:[#allocation5 + $0x28] sm:$0xff]  ;;  %v80_v14 = vld [vmem:[#allocation5 + $0x10] sm:$0xff] }
  0x4d   :  { %v86_v3 = vld [vmem:[#allocation5 + $0x40] sm:$0xff]  ;;  %v2374_v4 = vcombine.high %v78_v1, %v82_v2  ;;  %v2373_v5 = vcombine.low %v78_v1, %v82_v2  ;;  %v87_v10 = vld [vmem:[#allocation5 + $0x48] sm:$0xff]  ;;  %v2376_v11 = vcombine.high %v79_v8, %v83_v9  ;;  %v2375_v12 = vcombine.low %v79_v8, %v83_v9  ;;  %v84_v15 = vld [vmem:[#allocation5 + $0x30] sm:$0xff] }
  0x4e   :  { %v90_v6 = vld [vmem:[#allocation5 + $0x60] sm:$0xff]  ;;  %v91_v13 = vld [vmem:[#allocation5 + $0x68] sm:$0xff]  ;;  %v75_v17 = vld [vmem:[#allocation2] sm:$0xff]  ;;  %v2378_v21 = vcombine.high %v80_v14, %v84_v15  ;;  %v2377_v28 = vcombine.low %v80_v14, %v84_v15 }
  0x4f   :  { %v2382_v7 = vcombine.high %v86_v3, %v90_v6  ;;  %220 = vmatprep.subr.bf16.mxu0 %v2374_v4  ;;  %v2381_v16 = vcombine.low %v86_v3, %v90_v6  ;;  %v76_v18 = vld [vmem:[#allocation2 + $0x8] sm:$0xff]  ;;  %v2384_v19 = vcombine.high %v87_v10, %v91_v13  ;;  %263 = vmatprep.subr.bf16.mxu1 %v2376_v11  ;;  %v88_v22 = vld [vmem:[#allocation5 + $0x50] sm:$0xff] }
  0x50   :  { %221 = vmatpush1.bf16.msra.mxu0 %v2373_v5  ;;  %v81_v20 = vld [vmem:[#allocation5 + $0x18] sm:$0xff]  ;;  %264 = vmatpush1.bf16.msra.mxu1 %v2375_v12  ;;  %v2383_v24 = vcombine.low %v87_v10, %v91_v13  ;;  %v92_v25 = vld [vmem:[#allocation5 + $0x70] sm:$0xff]  ;;  %v77_v26 = vpack.c.bf16 %v76_v18, %v75_v17 }
  0x51   :  { %222 = vmatprep.subr.bf16.mxu0 %v2382_v7  ;;  %v85_v23 = vld [vmem:[#allocation5 + $0x38] sm:$0xff]  ;;  %265 = vmatprep.subr.bf16.mxu1 %v2384_v19  ;;  %v2386_v31 = vcombine.high %v88_v22, %v92_v25  ;;  %v2385_v34 = vcombine.low %v88_v22, %v92_v25  ;;  %v2706_v37 = vld [vmem:[#allocation8 + $0xc] ss:$16 sps:$4 sm:$0xff]   ;;  %v2704_v40 = vld [vmem:[#allocation8 + $0x8] ss:$16 sps:$4 sm:$0xff]  }
  0x52   :  { %v2380_v27 = vcombine.high %v81_v20, %v85_v23  ;;  %v89_v29 = vld [vmem:[#allocation5 + $0x58] sm:$0xff]  ;;  %v2379_v32 = vcombine.low %v81_v20, %v85_v23  ;;  %v2712_v41 = vld [vmem:[#allocation8 + $0x2c] ss:$16 sps:$4 sm:$0xff]   ;;  %v2710_v44 = vld [vmem:[#allocation8 + $0x28] ss:$16 sps:$4 sm:$0xff]  }
  0x53   :  { %v93_v30 = vld [vmem:[#allocation5 + $0x78] sm:$0xff]  ;;  %v2718_v45 = vld [vmem:[#allocation8 + $0x4c] ss:$16 sps:$4 sm:$0xff]   ;;  %v2716_v48 = vld [vmem:[#allocation8 + $0x48] ss:$16 sps:$4 sm:$0xff]  }
  0x54   :  { %223 = vmatpush1.bf16.msra.mxu0 %v2381_v16  ;;  %266 = vmatpush1.bf16.msra.mxu1 %v2383_v24  ;;  %v2388_v33 = vcombine.high %v89_v29, %v93_v30  ;;  %v2703_v35 = vld [vmem:[#allocation8 + $0x4] ss:$16 sps:$4 sm:$0xff]   ;;  %v2387_v36 = vcombine.low %v89_v29, %v93_v30  ;;  %v2701_v38 = vld [vmem:[#allocation8] ss:$16 sps:$4 sm:$0xff]   ;;  %v2724_v49 = vld [vmem:[#allocation8 + $0x6c] ss:$16 sps:$4 sm:$0xff]  }
  0x55   :  { %306 = vmatprep.subr.bf16.mxu0 %v2378_v21  ;;  %349 = vmatprep.subr.bf16.mxu1 %v2380_v27  ;;  %v2709_v39 = vld [vmem:[#allocation8 + $0x24] ss:$16 sps:$4 sm:$0xff]   ;;  %v2707_v42 = vld [vmem:[#allocation8 + $0x20] ss:$16 sps:$4 sm:$0xff]   ;;  %v2722_v52 = vld [vmem:[#allocation8 + $0x68] ss:$16 sps:$4 sm:$0xff]  }
  0x56   :  { %v2715_v43 = vld [vmem:[#allocation8 + $0x44] ss:$16 sps:$4 sm:$0xff]   ;;  %v2713_v46 = vld [vmem:[#allocation8 + $0x40] ss:$16 sps:$4 sm:$0xff]   ;;  %v2730_v53 = vld [vmem:[#allocation8 + $0x8c] ss:$16 sps:$4 sm:$0xff]  }
  0x57   :  { %2389 = vmatmul.mubr.msk.bf16.vlgmr.msra.gmra.mrb[0].mxu0 %vm216_vm0, %v77_v26  ;;  %2390 = vmatmul.mubr.msk.bf16.vlgmr.msra.gmra.mrb[0].mxu1 %vm216_vm0, %v77_v26  ;;  %v2721_v47 = vld [vmem:[#allocation8 + $0x64] ss:$16 sps:$4 sm:$0xff]   ;;  %v2719_v50 = vld [vmem:[#allocation8 + $0x60] ss:$16 sps:$4 sm:$0xff]   ;;  %v2728_v56 = vld [vmem:[#allocation8 + $0x88] ss:$16 sps:$4 sm:$0xff]  }
  0x58   :  { %307 = vmatpush1.bf16.msra.mxu0 %v2377_v28  ;;  %338 = vmatprep.mubr.bf16.mxu0 %v3213_v0  ;;  %v2727_v51 = vld [vmem:[#allocation8 + $0x84] ss:$16 sps:$4 sm:$0xff]   ;;  %v2725_v54 = vld [vmem:[#allocation8 + $0x80] ss:$16 sps:$4 sm:$0xff]   ;;  %v2736_v57 = vld [vmem:[#allocation8 + $0xac] ss:$16 sps:$4 sm:$0xff]  }
  0x59   :  { %308 = vmatprep.subr.bf16.mxu0 %v2386_v31  ;;  %350 = vmatpush1.bf16.msra.mxu1 %v2379_v32  ;;  %v2733_v55 = vld [vmem:[#allocation8 + $0xa4] ss:$16 sps:$4 sm:$0xff]   ;;  %v2731_v58 = vld [vmem:[#allocation8 + $0xa0] ss:$16 sps:$4 sm:$0xff]   ;;  %v2734_v60 = vld [vmem:[#allocation8 + $0xa8] ss:$16 sps:$4 sm:$0xff]  }
  0x5a   :  { %381 = vmatprep.mubr.bf16.mxu1 %v3213_v0  ;;  %351 = vmatprep.subr.bf16.mxu1 %v2388_v33  ;;  %v2739_v59 = vld [vmem:[#allocation8 + $0xc4] ss:$16 sps:$4 sm:$0xff]   ;;  %v2742_v61 = vld [vmem:[#allocation8 + $0xcc] ss:$16 sps:$4 sm:$0xff]   ;;  %v2737_v62 = vld [vmem:[#allocation8 + $0xc0] ss:$16 sps:$4 sm:$0xff]  }
  0x5b   :  { %v2740_v63 = vld [vmem:[#allocation8 + $0xc8] ss:$16 sps:$4 sm:$0xff]   ;;  %v2745_v0 = vld [vmem:[#allocation8 + $0xe4] ss:$16 sps:$4 sm:$0xff]   ;;  %v2743_v1 = vld [vmem:[#allocation8 + $0xe0] ss:$16 sps:$4 sm:$0xff]  }
  0x5c   :  { %309 = vmatpush1.bf16.msra.mxu0 %v2385_v34  ;;  %v2748_v2 = vld [vmem:[#allocation8 + $0xec] ss:$16 sps:$4 sm:$0xff]   ;;  %v2751_v3 = vld [vmem:[#allocation8 + $0x104] ss:$16 sps:$4 sm:$0xff]   ;;  %v2746_v4 = vld [vmem:[#allocation8 + $0xe8] ss:$16 sps:$4 sm:$0xff]  }
  0x5d   :  { %1974 = vmatprep.subr.bf16.mxu0 %v2703_v35  ;;  %352 = vmatpush1.bf16.msra.mxu1 %v2387_v36  ;;  %v2754_v5 = vld [vmem:[#allocation8 + $0x10c] ss:$16 sps:$4 sm:$0xff]   ;;  %v2749_v6 = vld [vmem:[#allocation8 + $0x100] ss:$16 sps:$4 sm:$0xff]   ;;  %v2757_v7 = vld [vmem:[#allocation8 + $0x124] ss:$16 sps:$4 sm:$0xff]  }
  0x5e   :  { %2146 = vmatprep.subr.bf16.mxu1 %v2706_v37  ;;  %v2752_v8 = vld [vmem:[#allocation8 + $0x108] ss:$16 sps:$4 sm:$0xff]   ;;  %v2760_v9 = vld [vmem:[#allocation8 + $0x12c] ss:$16 sps:$4 sm:$0xff]   ;;  %v2755_v10 = vld [vmem:[#allocation8 + $0x120] ss:$16 sps:$4 sm:$0xff]  }
  0x5f   :  { %2391 = vmatmul.mubr.msk.bf16.vlgmr.msra.gmra.mrb[4].mxu0 %vm216_vm0, %v77_v26  ;;  %v2763_v11 = vld [vmem:[#allocation8 + $0x144] ss:$16 sps:$4 sm:$0xff]   ;;  %v2758_v12 = vld [vmem:[#allocation8 + $0x128] ss:$16 sps:$4 sm:$0xff]   ;;  %v2766_v13 = vld [vmem:[#allocation8 + $0x14c] ss:$16 sps:$4 sm:$0xff]  }
  0x60   :  { %1975 = vmatpush1.bf16.msra.mxu0 %v2701_v38  ;;  %2392 = vmatmul.mubr.msk.bf16.vlgmr.msra.gmra.mrb[4].mxu1 %vm216_vm0, %v77_v26  ;;  %v2761_v14 = vld [vmem:[#allocation8 + $0x140] ss:$16 sps:$4 sm:$0xff]   ;;  %v2769_v15 = vld [vmem:[#allocation8 + $0x164] ss:$16 sps:$4 sm:$0xff]   ;;  %v2764_v16 = vld [vmem:[#allocation8 + $0x148] ss:$16 sps:$4 sm:$0xff]   ;;  %v96_v38 = vlaneseq }
  0x61   :  { %1976 = vmatprep.subr.bf16.mxu0 %v2709_v39  ;;  %2147 = vmatpush1.bf16.msra.mxu1 %v2704_v40  ;;  %v2772_v17 = vld [vmem:[#allocation8 + $0x16c] ss:$16 sps:$4 sm:$0xff]   ;;  %v2767_v18 = vld [vmem:[#allocation8 + $0x160] ss:$16 sps:$4 sm:$0xff]   ;;  %v2775_v19 = vld [vmem:[#allocation8 + $0x184] ss:$16 sps:$4 sm:$0xff]  }
  0x62   :  { %2148 = vmatprep.subr.bf16.mxu1 %v2712_v41  ;;  %v2770_v20 = vld [vmem:[#allocation8 + $0x168] ss:$16 sps:$4 sm:$0xff]   ;;  %v2778_v21 = vld [vmem:[#allocation8 + $0x18c] ss:$16 sps:$4 sm:$0xff]   ;;  %v2773_v22 = vld [vmem:[#allocation8 + $0x180] ss:$16 sps:$4 sm:$0xff]  }
  0x63   :  { %v2781_v23 = vld [vmem:[#allocation8 + $0x1a4] ss:$16 sps:$4 sm:$0xff]   ;;  %v2776_v24 = vld [vmem:[#allocation8 + $0x188] ss:$16 sps:$4 sm:$0xff]   ;;  %v2784_v25 = vld [vmem:[#allocation8 + $0x1ac] ss:$16 sps:$4 sm:$0xff]  }
  0x64   :  { %1977 = vmatpush1.bf16.msra.mxu0 %v2707_v42  ;;  %v2779_v26 = vld [vmem:[#allocation8 + $0x1a0] ss:$16 sps:$4 sm:$0xff]   ;;  %v2782_v27 = vld [vmem:[#allocation8 + $0x1a8] ss:$16 sps:$4 sm:$0xff]   ;;  %v2787_v28 = vld [vmem:[#allocation8 + $0x1c4] ss:$16 sps:$4 sm:$0xff]  }
  0x65   :  { %1978 = vmatprep.subr.bf16.mxu0 %v2715_v43  ;;  %2149 = vmatpush1.bf16.msra.mxu1 %v2710_v44  ;;  %v2790_v29 = vld [vmem:[#allocation8 + $0x1cc] ss:$16 sps:$4 sm:$0xff]   ;;  %v2785_v30 = vld [vmem:[#allocation8 + $0x1c0] ss:$16 sps:$4 sm:$0xff]   ;;  %v2788_v31 = vld [vmem:[#allocation8 + $0x1c8] ss:$16 sps:$4 sm:$0xff]  }
  0x66   :  { %2150 = vmatprep.subr.bf16.mxu1 %v2718_v45  ;;  %v2793_v32 = vld [vmem:[#allocation8 + $0x1e4] ss:$16 sps:$4 sm:$0xff]   ;;  %v2796_v33 = vld [vmem:[#allocation8 + $0x1ec] ss:$16 sps:$4 sm:$0xff]   ;;  %v2791_v34 = vld [vmem:[#allocation8 + $0x1e0] ss:$16 sps:$4 sm:$0xff]  }
  0x67   :  { %v2794_v35 = vld [vmem:[#allocation8 + $0x1e8] ss:$16 sps:$4 sm:$0xff]   ;;  %v2799_v36 = vld [vmem:[#allocation8 + $0x204] ss:$16 sps:$4 sm:$0xff]   ;;  %v2802_v37 = vld [vmem:[#allocation8 + $0x20c] ss:$16 sps:$4 sm:$0xff]  }
  0x68   :  { %1979 = vmatpush1.bf16.msra.mxu0 %v2713_v46  ;;  %v3307_v39 = vshrl.u32 %v96_v38, 7  ;;  %v3310_v41 = vld [vmem:[#allocation7] sm:$0xff]  ;;  %v2809_v38 = vld [vmem:[#allocation8 + $0x240] ss:$16 sps:$4 sm:$0xff]  }
  0x69   :  { %1980 = vmatprep.subr.bf16.mxu0 %v2721_v47  ;;  %2151 = vmatpush1.bf16.msra.mxu1 %v2716_v48 }
  0x6a   :  { %2152 = vmatprep.subr.bf16.mxu1 %v2724_v49  ;;  %v98_v40 = vsub.s32 0, %v3307_v39  ;;  %v102_v42 = vsub.s32 1, %v3307_v39  ;;  %v106_v43 = vsub.s32 2, %v3307_v39  ;;  %v110_v44 = vsub.s32 3, %v3307_v39 }
  0x6c   :  { %1981 = vmatpush1.bf16.msra.mxu0 %v2719_v50  ;;  %v99_v45 = vrot.slane %v3310_v41, %v98_v40  ;;  %v103_v46 = vrot.slane %v3310_v41, %v102_v42  ;;  %v107_v47 = vrot.slane %v3310_v41, %v106_v43  ;;  %v111_v49 = vrot.slane %v3310_v41, %v110_v44 }
  0x6d   :  { %1982 = vmatprep.subr.bf16.mxu0 %v2727_v51  ;;  %2153 = vmatpush1.bf16.msra.mxu1 %v2722_v52  ;;  %v114_v50 = vsub.s32 4, %v3307_v39  ;;  %v118_v51 = vsub.s32 5, %v3307_v39 }
  0x6e   :  { %2154 = vmatprep.subr.bf16.mxu1 %v2730_v53 }
  0x70   :  { %1983 = vmatpush1.bf16.msra.mxu0 %v2725_v54 }
  0x71   :  { %1984 = vmatprep.subr.bf16.mxu0 %v2733_v55  ;;  %2155 = vmatpush1.bf16.msra.mxu1 %v2728_v56 }
  0x72   :  { %2156 = vmatprep.subr.bf16.mxu1 %v2736_v57 }
  0x74   :  { %1985 = vmatpush1.bf16.msra.mxu0 %v2731_v58 }
  0x75   :  { %1986 = vmatprep.subr.bf16.mxu0 %v2739_v59  ;;  %2157 = vmatpush1.bf16.msra.mxu1 %v2734_v60 }
  0x76   :  { %2158 = vmatprep.subr.bf16.mxu1 %v2742_v61 }
  0x78   :  { %1987 = vmatpush1.bf16.msra.mxu0 %v2737_v62 }
  0x79   :  { %1988 = vmatprep.subr.bf16.mxu0 %v2745_v0  ;;  %2159 = vmatpush1.bf16.msra.mxu1 %v2740_v63  ;;  %v115_v0 = vrot.slane %v3310_v41, %v114_v50  ;;  %v2818_v50 = vld [vmem:[#allocation8 + $0x268] ss:$16 sps:$4 sm:$0xff]  }
  0x7a   :  { %2160 = vmatprep.subr.bf16.mxu1 %v2748_v2 }
  0x7c   :  { %1989 = vmatpush1.bf16.msra.mxu0 %v2743_v1  ;;  %v119_v1 = vrot.slane %v3310_v41, %v118_v51  ;;  %v2823_v51 = vld [vmem:[#allocation8 + $0x284] ss:$16 sps:$4 sm:$0xff]  }
  0x7d   :  { %1990 = vmatprep.subr.bf16.mxu0 %v2751_v3  ;;  %2161 = vmatpush1.bf16.msra.mxu1 %v2746_v4 }
  0x7e   :  { %2162 = vmatprep.subr.bf16.mxu1 %v2754_v5 }
  0x80   :  { %1991 = vmatpush1.bf16.msra.mxu0 %v2749_v6 }
  0x81   :  { %1992 = vmatprep.subr.bf16.mxu0 %v2757_v7  ;;  %2163 = vmatpush1.bf16.msra.mxu1 %v2752_v8 }
  0x82   :  { %2164 = vmatprep.subr.bf16.mxu1 %v2760_v9 }
  0x84   :  { %1993 = vmatpush1.bf16.msra.mxu0 %v2755_v10 }
  0x85   :  { %1994 = vmatprep.subr.bf16.mxu0 %v2763_v11  ;;  %2165 = vmatpush1.bf16.msra.mxu1 %v2758_v12 }
  0x86   :  { %2166 = vmatprep.subr.bf16.mxu1 %v2766_v13 }
  0x88   :  { %1995 = vmatpush1.bf16.msra.mxu0 %v2761_v14  ;;  %v2797_v14 = vld [vmem:[#allocation8 + $0x200] ss:$16 sps:$4 sm:$0xff]  }
  0x89   :  { %1996 = vmatprep.subr.bf16.mxu0 %v2769_v15  ;;  %2167 = vmatpush1.bf16.msra.mxu1 %v2764_v16  ;;  %v2800_v15 = vld [vmem:[#allocation8 + $0x208] ss:$16 sps:$4 sm:$0xff]  }
  0x8a   :  { %2168 = vmatprep.subr.bf16.mxu1 %v2772_v17 }
  0x8c   :  { %1997 = vmatpush1.bf16.msra.mxu0 %v2767_v18  ;;  %v2805_v18 = vld [vmem:[#allocation8 + $0x224] ss:$16 sps:$4 sm:$0xff]  }
  0x8d   :  { %1998 = vmatprep.subr.bf16.mxu0 %v2775_v19  ;;  %2169 = vmatpush1.bf16.msra.mxu1 %v2770_v20  ;;  %v2808_v19 = vld [vmem:[#allocation8 + $0x22c] ss:$16 sps:$4 sm:$0xff]  }
  0x8e   :  { %2170 = vmatprep.subr.bf16.mxu1 %v2778_v21 }
  0x90   :  { %1999 = vmatpush1.bf16.msra.mxu0 %v2773_v22 }
  0x91   :  { %2000 = vmatprep.subr.bf16.mxu0 %v2781_v23  ;;  %2171 = vmatpush1.bf16.msra.mxu1 %v2776_v24 }
  0x92   :  { %2172 = vmatprep.subr.bf16.mxu1 %v2784_v25 }
  0x94   :  { %2001 = vmatpush1.bf16.msra.mxu0 %v2779_v26 }
  0x95   :  { %2173 = vmatpush1.bf16.msra.mxu1 %v2782_v27  ;;  %2002 = vmatprep.subr.bf16.mxu0 %v2787_v28 }
  0x96   :  { %2174 = vmatprep.subr.bf16.mxu1 %v2790_v29  ;;  %v2803_v29 = vld [vmem:[#allocation8 + $0x220] ss:$16 sps:$4 sm:$0xff]  }
  0x98   :  { %2003 = vmatpush1.bf16.msra.mxu0 %v2785_v30  ;;  %v2806_v30 = vld [vmem:[#allocation8 + $0x228] ss:$16 sps:$4 sm:$0xff]  }
  0x99   :  { %2175 = vmatpush1.bf16.msra.mxu1 %v2788_v31  ;;  %2004 = vmatprep.subr.bf16.mxu0 %v2793_v32 }
  0x9a   :  { %2176 = vmatprep.subr.bf16.mxu1 %v2796_v33  ;;  %v2811_v33 = vld [vmem:[#allocation8 + $0x244] ss:$16 sps:$4 sm:$0xff]  }
  0x9c   :  { %2005 = vmatpush1.bf16.msra.mxu0 %v2791_v34  ;;  %v2814_v34 = vld [vmem:[#allocation8 + $0x24c] ss:$16 sps:$4 sm:$0xff]  }
  0x9d   :  { %2177 = vmatpush1.bf16.msra.mxu1 %v2794_v35  ;;  %2017 = vmatprep.subr.bf16.mxu0 %v2799_v36 }
  0x9e   :  { %2189 = vmatprep.subr.bf16.mxu1 %v2802_v37 }
 0x12a   :  { %v254_v48 = vpop.f32.mrb[0].mxu0  ;;  %v297_v56 = vpop.f32.mrb[0].mxu1 }
 0x12b   :  { %v255_v52 = vadd.f32 %v254_v48, %v99_v45  ;;  %v256_v53 = vpop.f32.mrb[1].mxu0  ;;  %v298_v59 = vadd.f32 %v297_v56, %v107_v47  ;;  %v299_v60 = vpop.f32.mrb[1].mxu1  ;;  %v2820_v48 = vld [vmem:[#allocation8 + $0x26c] ss:$16 sps:$4 sm:$0xff]  }
 0x12c   :  { %v257_v54 = vadd.f32 %v256_v53, %v103_v46  ;;  %v258_v55 = vpop.f32.mrb[2].mxu0  ;;  %v300_v62 = vadd.f32 %v299_v60, %v111_v49  ;;  %v301_v63 = vpop.f32.mrb[2].mxu1  ;;  %v2821_v53 = vld [vmem:[#allocation8 + $0x280] ss:$16 sps:$4 sm:$0xff]   ;;  %v2832_v56 = vld [vmem:[#allocation8 + $0x2ac] ss:$16 sps:$4 sm:$0xff]  }
 0x12d   :  { %v259_v57 = vadd.f32 %v258_v55, %v99_v45  ;;  %v260_v58 = vpop.f32.mrb[3].mxu0  ;;  %v392_v2 = vmax.f32 %v255_v52, 0.0  ;;  %v394_v4 = vmax.f32 %v298_v59, 0.0  ;;  %v302_v5 = vadd.f32 %v301_v63, %v107_v47  ;;  %v303_v6 = vpop.f32.mrb[3].mxu1  ;;  %v2812_v45 = vld [vmem:[#allocation8 + $0x248] ss:$16 sps:$4 sm:$0xff]  }
 0x12e   :  { %v261_v61 = vadd.f32 %v260_v58, %v103_v46  ;;  %v393_v7 = vmax.f32 %v257_v54, 0.0  ;;  %v395_v9 = vmax.f32 %v300_v62, 0.0  ;;  %v304_v10 = vadd.f32 %v303_v6, %v111_v49  ;;  %v2817_v47 = vld [vmem:[#allocation8 + $0x264] ss:$16 sps:$4 sm:$0xff]   ;;  %v2815_v49 = vld [vmem:[#allocation8 + $0x260] ss:$16 sps:$4 sm:$0xff]  }
 0x12f   :  { %v400_v3 = vmax.f32 %v259_v57, 0.0  ;;  %v402_v12 = vmax.f32 %v302_v5, 0.0  ;;  %v2826_v52 = vld [vmem:[#allocation8 + $0x28c] ss:$16 sps:$4 sm:$0xff]   ;;  %v2824_v54 = vld [vmem:[#allocation8 + $0x288] ss:$16 sps:$4 sm:$0xff]  }
 0x130   :  { %v401_v8 = vmax.f32 %v261_v61, 0.0  ;;  %v403_v16 = vmax.f32 %v304_v10, 0.0  ;;  %v2829_v55 = vld [vmem:[#allocation8 + $0x2a4] ss:$16 sps:$4 sm:$0xff]   ;;  %v122_v57 = vsub.s32 6, %v3307_v39  ;;  %v126_v62 = vsub.s32 7, %v3307_v39 }
 0x131   :  { %v408_v11 = vpack.c.bf16 %v400_v3, %v392_v2  ;;  %v3331_v20 = vpack.c.bf16 %v402_v12, %v394_v4  ;;  %v2827_v60 = vld [vmem:[#allocation8 + $0x2a0] ss:$16 sps:$4 sm:$0xff]   ;;  %v2830_v61 = vld [vmem:[#allocation8 + $0x2a8] ss:$16 sps:$4 sm:$0xff]  }
 0x132   :  { %v409_v13 = vpack.c.bf16 %v401_v8, %v393_v7  ;;  %v340_v17 = vpop.f32.mrb[4].mxu0  ;;  %v411_v23 = vpack.c.bf16 %v403_v16, %v395_v9  ;;  %v123_v59 = vrot.slane %v3310_v41, %v122_v57  ;;  %v127_v4 = vrot.slane %v3310_v41, %v126_v62  ;;  %v2833_v8 = vld [vmem:[#allocation8 + $0x2c0] ss:$16 sps:$4 sm:$0xff]   ;;  %v2836_v9 = vld [vmem:[#allocation8 + $0x2c8] ss:$16 sps:$4 sm:$0xff]  }
 0x133   :  { %v341_v21 = vadd.f32 %v340_v17, %v115_v0  ;;  %v342_v22 = vpop.f32.mrb[5].mxu0  ;;  %v383_v58 = vpop.f32.mrb[4].mxu1  ;;  %v2839_v41 = vld [vmem:[#allocation8 + $0x2e0] ss:$16 sps:$4 sm:$0xff]   ;;  %v2889_v57 = vld [vmem:[#allocation8 + $0x3e4] ss:$16 sps:$4 sm:$0xff]  }
 0x134   :  { %2006 = vmatprep.mubr.bf16.mxu0 %v409_v13  ;;  %2178 = vmatprep.mubr.bf16.mxu1 %v409_v13  ;;  %v343_v24 = vadd.f32 %v342_v22, %v119_v1  ;;  %v344_v25 = vpop.f32.mrb[6].mxu0  ;;  %v385_v63 = vpop.f32.mrb[5].mxu1  ;;  %v384_v2 = vadd.f32 %v383_v58, %v123_v59  ;;  %v2841_v13 = vld [vmem:[#allocation8 + $0x2e4] ss:$16 sps:$4 sm:$0xff]   ;;  %v2850_v22 = vld [vmem:[#allocation8 + $0x30c] ss:$16 sps:$4 sm:$0xff]  }
 0x135   :  { %2007 = vmatmul.mubr.bf16.vlgmr.msra.gmra.mrb[8].mxu0 %v408_v11  ;;  %2179 = vmatmul.mubr.bf16.vlgmr.msra.gmra.mrb[8].mxu1 %v408_v11  ;;  %v396_v26 = vmax.f32 %v341_v21, 0.0  ;;  %v345_v27 = vadd.f32 %v344_v25, %v115_v0  ;;  %v346_v28 = vpop.f32.mrb[7].mxu0  ;;  %v2835_v0 = vld [vmem:[#allocation8 + $0x2c4] ss:$16 sps:$4 sm:$0xff]   ;;  %v387_v3 = vpop.f32.mrb[6].mxu1  ;;  %v386_v10 = vadd.f32 %v385_v63, %v127_v4 }
 0x136   :  { %2018 = vmatpush1.bf16.msra.mxu0 %v2797_v14  ;;  %2190 = vmatpush1.bf16.msra.mxu1 %v2800_v15  ;;  %v397_v31 = vmax.f32 %v343_v24, 0.0  ;;  %v347_v32 = vadd.f32 %v346_v28, %v119_v1  ;;  %v2838_v1 = vld [vmem:[#allocation8 + $0x2cc] ss:$16 sps:$4 sm:$0xff]   ;;  %v388_v5 = vadd.f32 %v387_v3, %v123_v59  ;;  %v389_v6 = vpop.f32.mrb[7].mxu1  ;;  %v398_v7 = vmax.f32 %v384_v2, 0.0 }
 0x137   :  { %2019 = vmatprep.subr.bf16.mxu0 %v2805_v18  ;;  %2191 = vmatprep.subr.bf16.mxu1 %v2808_v19  ;;  %v404_v35 = vmax.f32 %v345_v27, 0.0  ;;  %v390_v12 = vadd.f32 %v389_v6, %v127_v4  ;;  %v2844_v14 = vld [vmem:[#allocation8 + $0x2ec] ss:$16 sps:$4 sm:$0xff]   ;;  %v399_v15 = vmax.f32 %v386_v10, 0.0  ;;  %v2842_v18 = vld [vmem:[#allocation8 + $0x2e8] ss:$16 sps:$4 sm:$0xff]  }
 0x138   :  { %2049 = vmatprep.mubr.bf16.mxu0 %v411_v23  ;;  %2221 = vmatprep.mubr.bf16.mxu1 %v411_v23  ;;  %v405_v36 = vmax.f32 %v347_v32, 0.0  ;;  %v406_v11 = vmax.f32 %v388_v5, 0.0  ;;  %v2847_v21 = vld [vmem:[#allocation8 + $0x304] ss:$16 sps:$4 sm:$0xff]   ;;  %v2845_v23 = vld [vmem:[#allocation8 + $0x300] ss:$16 sps:$4 sm:$0xff]  }
 0x139   :  { %v3333_v37 = vpack.c.bf16 %v404_v35, %v396_v26  ;;  %v407_v17 = vmax.f32 %v390_v12, 0.0  ;;  %v2848_v24 = vld [vmem:[#allocation8 + $0x308] ss:$16 sps:$4 sm:$0xff]   ;;  %v2853_v25 = vld [vmem:[#allocation8 + $0x324] ss:$16 sps:$4 sm:$0xff]  }
 0x13a   :  { %2020 = vmatpush1.bf16.msra.mxu0 %v2803_v29  ;;  %2192 = vmatpush1.bf16.msra.mxu1 %v2806_v30  ;;  %v3335_v46 = vpack.c.bf16 %v405_v36, %v397_v31  ;;  %v3341_v16 = vpack.c.bf16 %v406_v11, %v398_v7  ;;  %v2856_v26 = vld [vmem:[#allocation8 + $0x32c] ss:$16 sps:$4 sm:$0xff]   ;;  %v2851_v27 = vld [vmem:[#allocation8 + $0x320] ss:$16 sps:$4 sm:$0xff]   ;;  %v2854_v28 = vld [vmem:[#allocation8 + $0x328] ss:$16 sps:$4 sm:$0xff]  }
 0x13b   :  { %2021 = vmatprep.subr.bf16.mxu0 %v2811_v33  ;;  %2193 = vmatprep.subr.bf16.mxu1 %v2814_v34  ;;  %v3343_v19 = vpack.c.bf16 %v407_v17, %v399_v15  ;;  %v2859_v29 = vld [vmem:[#allocation8 + $0x344] ss:$16 sps:$4 sm:$0xff]   ;;  %v2862_v30 = vld [vmem:[#allocation8 + $0x34c] ss:$16 sps:$4 sm:$0xff]   ;;  %v2857_v31 = vld [vmem:[#allocation8 + $0x340] ss:$16 sps:$4 sm:$0xff]  }
 0x13c   :  { %v2860_v32 = vld [vmem:[#allocation8 + $0x348] ss:$16 sps:$4 sm:$0xff]   ;;  %v2865_v33 = vld [vmem:[#allocation8 + $0x364] ss:$16 sps:$4 sm:$0xff]   ;;  %v2868_v34 = vld [vmem:[#allocation8 + $0x36c] ss:$16 sps:$4 sm:$0xff]  }
 0x13d   :  { %v2863_v35 = vld [vmem:[#allocation8 + $0x360] ss:$16 sps:$4 sm:$0xff]   ;;  %v2866_v36 = vld [vmem:[#allocation8 + $0x368] ss:$16 sps:$4 sm:$0xff]   ;;  %v2892_v58 = vld [vmem:[#allocation8 + $0x3ec] ss:$16 sps:$4 sm:$0xff]  }
 0x13e   :  { %2022 = vmatpush1.bf16.msra.mxu0 %v2809_v38  ;;  %2194 = vmatpush1.bf16.msra.mxu1 %v2812_v45  ;;  %v2871_v38 = vld [vmem:[#allocation8 + $0x384] ss:$16 sps:$4 sm:$0xff]   ;;  %v2874_v45 = vld [vmem:[#allocation8 + $0x38c] ss:$16 sps:$4 sm:$0xff]   ;;  %v2887_v59 = vld [vmem:[#allocation8 + $0x3e0] ss:$16 sps:$4 sm:$0xff]  }
 0x13f   :  { %2023 = vmatprep.subr.bf16.mxu0 %v2817_v47  ;;  %2195 = vmatprep.subr.bf16.mxu1 %v2820_v48  ;;  %v2869_v47 = vld [vmem:[#allocation8 + $0x380] ss:$16 sps:$4 sm:$0xff]   ;;  %v2872_v48 = vld [vmem:[#allocation8 + $0x388] ss:$16 sps:$4 sm:$0xff]   ;;  %v2898_v62 = vld [vmem:[#allocation8 + $0x40c] ss:$16 sps:$4 sm:$0xff]  }
 0x140   :  { %v2893_v63 = vld [vmem:[#allocation8 + $0x400] ss:$16 sps:$4 sm:$0xff]   ;;  %v2904_v2 = vld [vmem:[#allocation8 + $0x42c] ss:$16 sps:$4 sm:$0xff]   ;;  %v2902_v4 = vld [vmem:[#allocation8 + $0x428] ss:$16 sps:$4 sm:$0xff]  }
 0x141   :  { %v2899_v3 = vld [vmem:[#allocation8 + $0x420] ss:$16 sps:$4 sm:$0xff]   ;;  %v2907_v5 = vld [vmem:[#allocation8 + $0x444] ss:$16 sps:$4 sm:$0xff]   ;;  %v2910_v6 = vld [vmem:[#allocation8 + $0x44c] ss:$16 sps:$4 sm:$0xff]  }
 0x142   :  { %2024 = vmatpush1.bf16.msra.mxu0 %v2815_v49  ;;  %2196 = vmatpush1.bf16.msra.mxu1 %v2818_v50  ;;  %v2877_v49 = vld [vmem:[#allocation8 + $0x3a4] ss:$16 sps:$4 sm:$0xff]   ;;  %v2880_v50 = vld [vmem:[#allocation8 + $0x3ac] ss:$16 sps:$4 sm:$0xff]   ;;  %v2905_v7 = vld [vmem:[#allocation8 + $0x440] ss:$16 sps:$4 sm:$0xff]  }
 0x143   :  { %2025 = vmatprep.subr.bf16.mxu0 %v2823_v51  ;;  %2197 = vmatprep.subr.bf16.mxu1 %v2826_v52  ;;  %v2875_v51 = vld [vmem:[#allocation8 + $0x3a0] ss:$16 sps:$4 sm:$0xff]   ;;  %v2878_v52 = vld [vmem:[#allocation8 + $0x3a8] ss:$16 sps:$4 sm:$0xff]   ;;  %v2919_v12 = vld [vmem:[#allocation8 + $0x484] ss:$16 sps:$4 sm:$0xff]  }
 0x144   :  { %v2911_v10 = vld [vmem:[#allocation8 + $0x460] ss:$16 sps:$4 sm:$0xff]   ;;  %v2914_v11 = vld [vmem:[#allocation8 + $0x468] ss:$16 sps:$4 sm:$0xff]   ;;  %v2925_v15 = vld [vmem:[#allocation8 + $0x4a4] ss:$16 sps:$4 sm:$0xff]  }
 0x145   :  { %v2928_v17 = vld [vmem:[#allocation8 + $0x4ac] ss:$16 sps:$4 sm:$0xff]  }
 0x146   :  { %2026 = vmatpush1.bf16.msra.mxu0 %v2821_v53  ;;  %2198 = vmatpush1.bf16.msra.mxu1 %v2824_v54  ;;  %v2883_v53 = vld [vmem:[#allocation8 + $0x3c4] ss:$16 sps:$4 sm:$0xff]   ;;  %v2886_v54 = vld [vmem:[#allocation8 + $0x3cc] ss:$16 sps:$4 sm:$0xff]  }
 0x147   :  { %2027 = vmatprep.subr.bf16.mxu0 %v2829_v55  ;;  %2199 = vmatprep.subr.bf16.mxu1 %v2832_v56  ;;  %v2881_v55 = vld [vmem:[#allocation8 + $0x3c0] ss:$16 sps:$4 sm:$0xff]   ;;  %v2884_v56 = vld [vmem:[#allocation8 + $0x3c8] ss:$16 sps:$4 sm:$0xff]  }
 0x14a   :  { %2028 = vmatpush1.bf16.msra.mxu0 %v2827_v60  ;;  %2200 = vmatpush1.bf16.msra.mxu1 %v2830_v61  ;;  %v2890_v60 = vld [vmem:[#allocation8 + $0x3e8] ss:$16 sps:$4 sm:$0xff]   ;;  %v2895_v61 = vld [vmem:[#allocation8 + $0x404] ss:$16 sps:$4 sm:$0xff]  }
 0x14b   :  { %2029 = vmatprep.subr.bf16.mxu0 %v2835_v0  ;;  %2201 = vmatprep.subr.bf16.mxu1 %v2838_v1  ;;  %v2896_v0 = vld [vmem:[#allocation8 + $0x408] ss:$16 sps:$4 sm:$0xff]   ;;  %v2901_v1 = vld [vmem:[#allocation8 + $0x424] ss:$16 sps:$4 sm:$0xff]  }
 0x14e   :  { %2030 = vmatpush1.bf16.msra.mxu0 %v2833_v8  ;;  %2202 = vmatpush1.bf16.msra.mxu1 %v2836_v9  ;;  %v2908_v8 = vld [vmem:[#allocation8 + $0x448] ss:$16 sps:$4 sm:$0xff]   ;;  %v2913_v9 = vld [vmem:[#allocation8 + $0x464] ss:$16 sps:$4 sm:$0xff]  }
 0x14f   :  { %2031 = vmatprep.subr.bf16.mxu0 %v2841_v13  ;;  %2203 = vmatprep.subr.bf16.mxu1 %v2844_v14  ;;  %v2922_v13 = vld [vmem:[#allocation8 + $0x48c] ss:$16 sps:$4 sm:$0xff]   ;;  %v2917_v14 = vld [vmem:[#allocation8 + $0x480] ss:$16 sps:$4 sm:$0xff]  }
 0x152   :  { %2032 = vmatpush1.bf16.msra.mxu0 %v2839_v41  ;;  %2204 = vmatpush1.bf16.msra.mxu1 %v2842_v18  ;;  %v2923_v41 = vld [vmem:[#allocation8 + $0x4a0] ss:$16 sps:$4 sm:$0xff]   ;;  %v2926_v18 = vld [vmem:[#allocation8 + $0x4a8] ss:$16 sps:$4 sm:$0xff]  }
 0x153   :  { %2033 = vmatprep.subr.bf16.mxu0 %v2847_v21  ;;  %2205 = vmatprep.subr.bf16.mxu1 %v2850_v22  ;;  %v2931_v21 = vld [vmem:[#allocation8 + $0x4c4] ss:$16 sps:$4 sm:$0xff]   ;;  %v2934_v22 = vld [vmem:[#allocation8 + $0x4cc] ss:$16 sps:$4 sm:$0xff]  }
 0x156   :  { %2034 = vmatpush1.bf16.msra.mxu0 %v2845_v23  ;;  %2206 = vmatpush1.bf16.msra.mxu1 %v2848_v24  ;;  %v2929_v23 = vld [vmem:[#allocation8 + $0x4c0] ss:$16 sps:$4 sm:$0xff]   ;;  %v2932_v24 = vld [vmem:[#allocation8 + $0x4c8] ss:$16 sps:$4 sm:$0xff]  }
 0x157   :  { %2035 = vmatprep.subr.bf16.mxu0 %v2853_v25  ;;  %2207 = vmatprep.subr.bf16.mxu1 %v2856_v26  ;;  %v2937_v25 = vld [vmem:[#allocation8 + $0x4e4] ss:$16 sps:$4 sm:$0xff]   ;;  %v2940_v26 = vld [vmem:[#allocation8 + $0x4ec] ss:$16 sps:$4 sm:$0xff]  }
 0x15a   :  { %2036 = vmatpush1.bf16.msra.mxu0 %v2851_v27  ;;  %2208 = vmatpush1.bf16.msra.mxu1 %v2854_v28  ;;  %v2935_v27 = vld [vmem:[#allocation8 + $0x4e0] ss:$16 sps:$4 sm:$0xff]   ;;  %v2938_v28 = vld [vmem:[#allocation8 + $0x4e8] ss:$16 sps:$4 sm:$0xff]  }
 0x15b   :  { %2037 = vmatprep.subr.bf16.mxu0 %v2859_v29  ;;  %2209 = vmatprep.subr.bf16.mxu1 %v2862_v30  ;;  %v2943_v29 = vld [vmem:[#allocation8 + $0x504] ss:$16 sps:$4 sm:$0xff]   ;;  %v2946_v30 = vld [vmem:[#allocation8 + $0x50c] ss:$16 sps:$4 sm:$0xff]  }
 0x15e   :  { %2038 = vmatpush1.bf16.msra.mxu0 %v2857_v31  ;;  %2210 = vmatpush1.bf16.msra.mxu1 %v2860_v32  ;;  %v2941_v31 = vld [vmem:[#allocation8 + $0x500] ss:$16 sps:$4 sm:$0xff]   ;;  %v2944_v32 = vld [vmem:[#allocation8 + $0x508] ss:$16 sps:$4 sm:$0xff]  }
 0x15f   :  { %2039 = vmatprep.subr.bf16.mxu0 %v2865_v33  ;;  %2211 = vmatprep.subr.bf16.mxu1 %v2868_v34  ;;  %v2949_v33 = vld [vmem:[#allocation8 + $0x524] ss:$16 sps:$4 sm:$0xff]   ;;  %v2952_v34 = vld [vmem:[#allocation8 + $0x52c] ss:$16 sps:$4 sm:$0xff]  }
 0x162   :  { %2040 = vmatpush1.bf16.msra.mxu0 %v2863_v35  ;;  %2212 = vmatpush1.bf16.msra.mxu1 %v2866_v36  ;;  %v2947_v35 = vld [vmem:[#allocation8 + $0x520] ss:$16 sps:$4 sm:$0xff]   ;;  %v2950_v36 = vld [vmem:[#allocation8 + $0x528] ss:$16 sps:$4 sm:$0xff]  }
 0x163   :  { %2041 = vmatprep.subr.bf16.mxu0 %v2871_v38  ;;  %2213 = vmatprep.subr.bf16.mxu1 %v2874_v45  ;;  %v2955_v38 = vld [vmem:[#allocation8 + $0x544] ss:$16 sps:$4 sm:$0xff]   ;;  %v2958_v45 = vld [vmem:[#allocation8 + $0x54c] ss:$16 sps:$4 sm:$0xff]  }
 0x166   :  { %2042 = vmatpush1.bf16.msra.mxu0 %v2869_v47  ;;  %2214 = vmatpush1.bf16.msra.mxu1 %v2872_v48  ;;  %v2953_v47 = vld [vmem:[#allocation8 + $0x540] ss:$16 sps:$4 sm:$0xff]   ;;  %v2956_v48 = vld [vmem:[#allocation8 + $0x548] ss:$16 sps:$4 sm:$0xff]  }
 0x167   :  { %2043 = vmatprep.subr.bf16.mxu0 %v2877_v49  ;;  %2215 = vmatprep.subr.bf16.mxu1 %v2880_v50  ;;  %v2961_v49 = vld [vmem:[#allocation8 + $0x564] ss:$16 sps:$4 sm:$0xff]   ;;  %v2964_v50 = vld [vmem:[#allocation8 + $0x56c] ss:$16 sps:$4 sm:$0xff]  }
 0x16a   :  { %2044 = vmatpush1.bf16.msra.mxu0 %v2875_v51  ;;  %2216 = vmatpush1.bf16.msra.mxu1 %v2878_v52  ;;  %v2959_v51 = vld [vmem:[#allocation8 + $0x560] ss:$16 sps:$4 sm:$0xff]   ;;  %v2962_v52 = vld [vmem:[#allocation8 + $0x568] ss:$16 sps:$4 sm:$0xff]  }
 0x16b   :  { %2045 = vmatprep.subr.bf16.mxu0 %v2883_v53  ;;  %2217 = vmatprep.subr.bf16.mxu1 %v2886_v54  ;;  %v2967_v53 = vld [vmem:[#allocation8 + $0x584] ss:$16 sps:$4 sm:$0xff]   ;;  %v2970_v54 = vld [vmem:[#allocation8 + $0x58c] ss:$16 sps:$4 sm:$0xff]  }
 0x16e   :  { %2046 = vmatpush1.bf16.msra.mxu0 %v2881_v55  ;;  %2218 = vmatpush1.bf16.msra.mxu1 %v2884_v56  ;;  %v2965_v55 = vld [vmem:[#allocation8 + $0x580] ss:$16 sps:$4 sm:$0xff]   ;;  %v2968_v56 = vld [vmem:[#allocation8 + $0x588] ss:$16 sps:$4 sm:$0xff]  }
 0x16f   :  { %2047 = vmatprep.subr.bf16.mxu0 %v2889_v57  ;;  %2219 = vmatprep.subr.bf16.mxu1 %v2892_v58  ;;  %v2973_v57 = vld [vmem:[#allocation8 + $0x5a4] ss:$16 sps:$4 sm:$0xff]   ;;  %v2976_v58 = vld [vmem:[#allocation8 + $0x5ac] ss:$16 sps:$4 sm:$0xff]  }
 0x172   :  { %2048 = vmatpush1.bf16.msra.mxu0 %v2887_v59  ;;  %2220 = vmatpush1.bf16.msra.mxu1 %v2890_v60  ;;  %v2971_v59 = vld [vmem:[#allocation8 + $0x5a0] ss:$16 sps:$4 sm:$0xff]   ;;  %v2974_v60 = vld [vmem:[#allocation8 + $0x5a8] ss:$16 sps:$4 sm:$0xff]  }
 0x173   :  { %2060 = vmatprep.subr.bf16.mxu0 %v2895_v61  ;;  %2232 = vmatprep.subr.bf16.mxu1 %v2898_v62  ;;  %v2979_v61 = vld [vmem:[#allocation8 + $0x5c4] ss:$16 sps:$4 sm:$0xff]   ;;  %v2982_v62 = vld [vmem:[#allocation8 + $0x5cc] ss:$16 sps:$4 sm:$0xff]  }
 0x175   :  { %2050 = vmatmul.mubr.bf16.vlgmr.msra.gmra.mrb[8].mxu0 %v3331_v20  ;;  %2222 = vmatmul.mubr.bf16.vlgmr.msra.gmra.mrb[8].mxu1 %v3331_v20  ;;  %v2916_v20 = vld [vmem:[#allocation8 + $0x46c] ss:$16 sps:$4 sm:$0xff]  }
 0x176   :  { %2061 = vmatpush1.bf16.msra.mxu0 %v2893_v63  ;;  %2233 = vmatpush1.bf16.msra.mxu1 %v2896_v0  ;;  %v2977_v63 = vld [vmem:[#allocation8 + $0x5c0] ss:$16 sps:$4 sm:$0xff]   ;;  %v2980_v0 = vld [vmem:[#allocation8 + $0x5c8] ss:$16 sps:$4 sm:$0xff]  }
 0x177   :  { %2062 = vmatprep.subr.bf16.mxu0 %v2901_v1  ;;  %2234 = vmatprep.subr.bf16.mxu1 %v2904_v2  ;;  %v2985_v1 = vld [vmem:[#allocation8 + $0x5e4] ss:$16 sps:$4 sm:$0xff]   ;;  %v2988_v2 = vld [vmem:[#allocation8 + $0x5ec] ss:$16 sps:$4 sm:$0xff]  }
 0x178   :  { %2092 = vmatprep.mubr.bf16.mxu0 %v3335_v46  ;;  %2264 = vmatprep.mubr.bf16.mxu1 %v3335_v46  ;;  %v2920_v46 = vld [vmem:[#allocation8 + $0x488] ss:$16 sps:$4 sm:$0xff]  }
 0x17a   :  { %2063 = vmatpush1.bf16.msra.mxu0 %v2899_v3  ;;  %2235 = vmatpush1.bf16.msra.mxu1 %v2902_v4  ;;  %v2983_v3 = vld [vmem:[#allocation8 + $0x5e0] ss:$16 sps:$4 sm:$0xff]   ;;  %v2986_v4 = vld [vmem:[#allocation8 + $0x5e8] ss:$16 sps:$4 sm:$0xff]  }
 0x17b   :  { %2064 = vmatprep.subr.bf16.mxu0 %v2907_v5  ;;  %2236 = vmatprep.subr.bf16.mxu1 %v2910_v6  ;;  %v2991_v5 = vld [vmem:[#allocation8 + $0x604] ss:$16 sps:$4 sm:$0xff]   ;;  %v2994_v6 = vld [vmem:[#allocation8 + $0x60c] ss:$16 sps:$4 sm:$0xff]  }
 0x17e   :  { %2065 = vmatpush1.bf16.msra.mxu0 %v2905_v7  ;;  %2237 = vmatpush1.bf16.msra.mxu1 %v2908_v8  ;;  %v2989_v7 = vld [vmem:[#allocation8 + $0x600] ss:$16 sps:$4 sm:$0xff]   ;;  %v2992_v8 = vld [vmem:[#allocation8 + $0x608] ss:$16 sps:$4 sm:$0xff]  }
 0x17f   :  { %2066 = vmatprep.subr.bf16.mxu0 %v2913_v9  ;;  %2238 = vmatprep.subr.bf16.mxu1 %v2916_v20  ;;  %v2997_v9 = vld [vmem:[#allocation8 + $0x624] ss:$16 sps:$4 sm:$0xff]   ;;  %v3000_v20 = vld [vmem:[#allocation8 + $0x62c] ss:$16 sps:$4 sm:$0xff]  }
 0x182   :  { %2067 = vmatpush1.bf16.msra.mxu0 %v2911_v10  ;;  %2239 = vmatpush1.bf16.msra.mxu1 %v2914_v11  ;;  %v2995_v10 = vld [vmem:[#allocation8 + $0x620] ss:$16 sps:$4 sm:$0xff]   ;;  %v2998_v11 = vld [vmem:[#allocation8 + $0x628] ss:$16 sps:$4 sm:$0xff]  }
 0x183   :  { %2068 = vmatprep.subr.bf16.mxu0 %v2919_v12  ;;  %2240 = vmatprep.subr.bf16.mxu1 %v2922_v13  ;;  %v3003_v12 = vld [vmem:[#allocation8 + $0x644] ss:$16 sps:$4 sm:$0xff]   ;;  %v3006_v13 = vld [vmem:[#allocation8 + $0x64c] ss:$16 sps:$4 sm:$0xff]  }
 0x186   :  { %2069 = vmatpush1.bf16.msra.mxu0 %v2917_v14  ;;  %2241 = vmatpush1.bf16.msra.mxu1 %v2920_v46  ;;  %v3001_v14 = vld [vmem:[#allocation8 + $0x640] ss:$16 sps:$4 sm:$0xff]   ;;  %v3004_v46 = vld [vmem:[#allocation8 + $0x648] ss:$16 sps:$4 sm:$0xff]  }
 0x187   :  { %2070 = vmatprep.subr.bf16.mxu0 %v2925_v15  ;;  %2242 = vmatprep.subr.bf16.mxu1 %v2928_v17  ;;  %v3009_v15 = vld [vmem:[#allocation8 + $0x664] ss:$16 sps:$4 sm:$0xff]   ;;  %v3007_v17 = vld [vmem:[#allocation8 + $0x660] ss:$16 sps:$4 sm:$0xff]  }
 0x18a   :  { %2071 = vmatpush1.bf16.msra.mxu0 %v2923_v41  ;;  %2243 = vmatpush1.bf16.msra.mxu1 %v2926_v18  ;;  %v3010_v41 = vld [vmem:[#allocation8 + $0x668] ss:$16 sps:$4 sm:$0xff]   ;;  %v3015_v18 = vld [vmem:[#allocation8 + $0x684] ss:$16 sps:$4 sm:$0xff]  }
 0x18b   :  { %2072 = vmatprep.subr.bf16.mxu0 %v2931_v21  ;;  %2244 = vmatprep.subr.bf16.mxu1 %v2934_v22  ;;  %v3018_v21 = vld [vmem:[#allocation8 + $0x68c] ss:$16 sps:$4 sm:$0xff]   ;;  %v3013_v22 = vld [vmem:[#allocation8 + $0x680] ss:$16 sps:$4 sm:$0xff]  }
 0x18e   :  { %2073 = vmatpush1.bf16.msra.mxu0 %v2929_v23  ;;  %2245 = vmatpush1.bf16.msra.mxu1 %v2932_v24  ;;  %v3021_v23 = vld [vmem:[#allocation8 + $0x6a4] ss:$16 sps:$4 sm:$0xff]   ;;  %v3024_v24 = vld [vmem:[#allocation8 + $0x6ac] ss:$16 sps:$4 sm:$0xff]  }
 0x18f   :  { %2074 = vmatprep.subr.bf16.mxu0 %v2937_v25  ;;  %2246 = vmatprep.subr.bf16.mxu1 %v2940_v26  ;;  %v3019_v25 = vld [vmem:[#allocation8 + $0x6a0] ss:$16 sps:$4 sm:$0xff]   ;;  %v3022_v26 = vld [vmem:[#allocation8 + $0x6a8] ss:$16 sps:$4 sm:$0xff]  }
 0x192   :  { %2075 = vmatpush1.bf16.msra.mxu0 %v2935_v27  ;;  %2247 = vmatpush1.bf16.msra.mxu1 %v2938_v28  ;;  %v3027_v27 = vld [vmem:[#allocation8 + $0x6c4] ss:$16 sps:$4 sm:$0xff]   ;;  %v3030_v28 = vld [vmem:[#allocation8 + $0x6cc] ss:$16 sps:$4 sm:$0xff]  }
 0x193   :  { %2076 = vmatprep.subr.bf16.mxu0 %v2943_v29  ;;  %2248 = vmatprep.subr.bf16.mxu1 %v2946_v30  ;;  %v3025_v29 = vld [vmem:[#allocation8 + $0x6c0] ss:$16 sps:$4 sm:$0xff]   ;;  %v3028_v30 = vld [vmem:[#allocation8 + $0x6c8] ss:$16 sps:$4 sm:$0xff]  }
 0x196   :  { %2077 = vmatpush1.bf16.msra.mxu0 %v2941_v31  ;;  %2249 = vmatpush1.bf16.msra.mxu1 %v2944_v32  ;;  %v3033_v31 = vld [vmem:[#allocation8 + $0x6e4] ss:$16 sps:$4 sm:$0xff]   ;;  %v3036_v32 = vld [vmem:[#allocation8 + $0x6ec] ss:$16 sps:$4 sm:$0xff]  }
 0x197   :  { %2078 = vmatprep.subr.bf16.mxu0 %v2949_v33  ;;  %2250 = vmatprep.subr.bf16.mxu1 %v2952_v34  ;;  %v3031_v33 = vld [vmem:[#allocation8 + $0x6e0] ss:$16 sps:$4 sm:$0xff]   ;;  %v3034_v34 = vld [vmem:[#allocation8 + $0x6e8] ss:$16 sps:$4 sm:$0xff]  }
 0x19a   :  { %2079 = vmatpush1.bf16.msra.mxu0 %v2947_v35  ;;  %2251 = vmatpush1.bf16.msra.mxu1 %v2950_v36  ;;  %v3039_v35 = vld [vmem:[#allocation8 + $0x704] ss:$16 sps:$4 sm:$0xff]   ;;  %v3042_v36 = vld [vmem:[#allocation8 + $0x70c] ss:$16 sps:$4 sm:$0xff]  }
 0x19b   :  { %2080 = vmatprep.subr.bf16.mxu0 %v2955_v38  ;;  %2252 = vmatprep.subr.bf16.mxu1 %v2958_v45  ;;  %v3037_v38 = vld [vmem:[#allocation8 + $0x700] ss:$16 sps:$4 sm:$0xff]   ;;  %v3040_v45 = vld [vmem:[#allocation8 + $0x708] ss:$16 sps:$4 sm:$0xff]  }
 0x19e   :  { %2081 = vmatpush1.bf16.msra.mxu0 %v2953_v47  ;;  %2253 = vmatpush1.bf16.msra.mxu1 %v2956_v48  ;;  %v3045_v47 = vld [vmem:[#allocation8 + $0x724] ss:$16 sps:$4 sm:$0xff]   ;;  %v3048_v48 = vld [vmem:[#allocation8 + $0x72c] ss:$16 sps:$4 sm:$0xff]  }
 0x19f   :  { %2082 = vmatprep.subr.bf16.mxu0 %v2961_v49  ;;  %2254 = vmatprep.subr.bf16.mxu1 %v2964_v50  ;;  %v3043_v49 = vld [vmem:[#allocation8 + $0x720] ss:$16 sps:$4 sm:$0xff]   ;;  %v3046_v50 = vld [vmem:[#allocation8 + $0x728] ss:$16 sps:$4 sm:$0xff]  }
 0x1a2   :  { %2083 = vmatpush1.bf16.msra.mxu0 %v2959_v51  ;;  %2255 = vmatpush1.bf16.msra.mxu1 %v2962_v52  ;;  %v3051_v51 = vld [vmem:[#allocation8 + $0x744] ss:$16 sps:$4 sm:$0xff]   ;;  %v3054_v52 = vld [vmem:[#allocation8 + $0x74c] ss:$16 sps:$4 sm:$0xff]  }
 0x1a3   :  { %2084 = vmatprep.subr.bf16.mxu0 %v2967_v53  ;;  %2256 = vmatprep.subr.bf16.mxu1 %v2970_v54  ;;  %v3049_v53 = vld [vmem:[#allocation8 + $0x740] ss:$16 sps:$4 sm:$0xff]   ;;  %v3052_v54 = vld [vmem:[#allocation8 + $0x748] ss:$16 sps:$4 sm:$0xff]  }
 0x1a6   :  { %2085 = vmatpush1.bf16.msra.mxu0 %v2965_v55  ;;  %2257 = vmatpush1.bf16.msra.mxu1 %v2968_v56  ;;  %v3057_v55 = vld [vmem:[#allocation8 + $0x764] ss:$16 sps:$4 sm:$0xff]   ;;  %v3060_v56 = vld [vmem:[#allocation8 + $0x76c] ss:$16 sps:$4 sm:$0xff]  }
 0x1a7   :  { %2086 = vmatprep.subr.bf16.mxu0 %v2973_v57  ;;  %2258 = vmatprep.subr.bf16.mxu1 %v2976_v58  ;;  %v3055_v57 = vld [vmem:[#allocation8 + $0x760] ss:$16 sps:$4 sm:$0xff]   ;;  %v3058_v58 = vld [vmem:[#allocation8 + $0x768] ss:$16 sps:$4 sm:$0xff]  }
 0x1aa   :  { %2087 = vmatpush1.bf16.msra.mxu0 %v2971_v59  ;;  %2259 = vmatpush1.bf16.msra.mxu1 %v2974_v60  ;;  %v3063_v59 = vld [vmem:[#allocation8 + $0x784] ss:$16 sps:$4 sm:$0xff]   ;;  %v3066_v60 = vld [vmem:[#allocation8 + $0x78c] ss:$16 sps:$4 sm:$0xff]  }
 0x1ab   :  { %2088 = vmatprep.subr.bf16.mxu0 %v2979_v61  ;;  %2260 = vmatprep.subr.bf16.mxu1 %v2982_v62  ;;  %v3061_v61 = vld [vmem:[#allocation8 + $0x780] ss:$16 sps:$4 sm:$0xff]   ;;  %v3064_v62 = vld [vmem:[#allocation8 + $0x788] ss:$16 sps:$4 sm:$0xff]  }
 0x1ae   :  { %2089 = vmatpush1.bf16.msra.mxu0 %v2977_v63  ;;  %2261 = vmatpush1.bf16.msra.mxu1 %v2980_v0  ;;  %v3069_v63 = vld [vmem:[#allocation8 + $0x7a4] ss:$16 sps:$4 sm:$0xff]   ;;  %v3072_v0 = vld [vmem:[#allocation8 + $0x7ac] ss:$16 sps:$4 sm:$0xff]  }
 0x1af   :  { %2090 = vmatprep.subr.bf16.mxu0 %v2985_v1  ;;  %2262 = vmatprep.subr.bf16.mxu1 %v2988_v2  ;;  %v3067_v1 = vld [vmem:[#allocation8 + $0x7a0] ss:$16 sps:$4 sm:$0xff]   ;;  %v3070_v2 = vld [vmem:[#allocation8 + $0x7a8] ss:$16 sps:$4 sm:$0xff]  }
 0x1b2   :  { %2091 = vmatpush1.bf16.msra.mxu0 %v2983_v3  ;;  %2263 = vmatpush1.bf16.msra.mxu1 %v2986_v4  ;;  %v3075_v3 = vld [vmem:[#allocation8 + $0x7c4] ss:$16 sps:$4 sm:$0xff]   ;;  %v3078_v4 = vld [vmem:[#allocation8 + $0x7cc] ss:$16 sps:$4 sm:$0xff]  }
 0x1b3   :  { %2103 = vmatprep.subr.bf16.mxu0 %v2991_v5  ;;  %2275 = vmatprep.subr.bf16.mxu1 %v2994_v6  ;;  %v3073_v5 = vld [vmem:[#allocation8 + $0x7c0] ss:$16 sps:$4 sm:$0xff]   ;;  %v3076_v6 = vld [vmem:[#allocation8 + $0x7c8] ss:$16 sps:$4 sm:$0xff]  }
 0x1b5   :  { %2093 = vmatmul.mubr.bf16.vlgmr.msra.gmra.mrb[8].mxu0 %v3333_v37  ;;  %2265 = vmatmul.mubr.bf16.vlgmr.msra.gmra.mrb[8].mxu1 %v3333_v37  ;;  %v3012_v37 = vld [vmem:[#allocation8 + $0x66c] ss:$16 sps:$4 sm:$0xff]  }
 0x1b6   :  { %2104 = vmatpush1.bf16.msra.mxu0 %v2989_v7  ;;  %2276 = vmatpush1.bf16.msra.mxu1 %v2992_v8  ;;  %v3081_v7 = vld [vmem:[#allocation8 + $0x7e4] ss:$16 sps:$4 sm:$0xff]   ;;  %v3084_v8 = vld [vmem:[#allocation8 + $0x7ec] ss:$16 sps:$4 sm:$0xff]  }
 0x1b7   :  { %2105 = vmatprep.subr.bf16.mxu0 %v2997_v9  ;;  %2277 = vmatprep.subr.bf16.mxu1 %v3000_v20  ;;  %v3079_v9 = vld [vmem:[#allocation8 + $0x7e0] ss:$16 sps:$4 sm:$0xff]   ;;  %v3082_v20 = vld [vmem:[#allocation8 + $0x7e8] ss:$16 sps:$4 sm:$0xff]  }
 0x1b8   :  { %2135 = vmatprep.mubr.bf16.mxu0 %v3343_v19  ;;  %2307 = vmatprep.mubr.bf16.mxu1 %v3343_v19  ;;  %v3016_v19 = vld [vmem:[#allocation8 + $0x688] ss:$16 sps:$4 sm:$0xff]  }
 0x1ba   :  { %2106 = vmatpush1.bf16.msra.mxu0 %v2995_v10  ;;  %2278 = vmatpush1.bf16.msra.mxu1 %v2998_v11  ;;  %v672_v10 = vld [vmem:[%s3385_s4] sm:$0xf]  ;;  %s3214_s4 = smov [#allocation10]  }
 0x1bb   :  { %2107 = vmatprep.subr.bf16.mxu0 %v3003_v12  ;;  %2279 = vmatprep.subr.bf16.mxu1 %v3006_v13  ;;  %v677_v11 = vrot.slane %v672_v10, %v98_v40  ;;  %v685_v12 = vrot.slane %v672_v10, %v106_v43  ;;  %v681_v13 = vrot.slane %v672_v10, %v102_v42  ;;  %s2359_s19 = sshll.u32 %s3214_s4, 4  ;;  %s2360_s19 = int_to_ptr.vmem [resolvable:$true] %s2359_s19 }
 0x1bc   :  { %s3173_s20 = scalar_lea.vmem %s2360_s19, 512  ;;  %p3178_p5 = scmp.lt.s32.totalorder %s2360_s19, %s2360_s19 }
 0x1bd   :  { %p3174_p4 = scmp.ne.s32.totalorder %s2360_s19, %s3173_s20  ;;  %p3179_p6 = scmp.lt.s32.totalorder %s3173_s20, %s3173_s20 }
 0x1be   :  { %2108 = vmatpush1.bf16.msra.mxu0 %v3001_v14  ;;  %2280 = vmatpush1.bf16.msra.mxu1 %v3004_v46  ;;  %v689_v14 = vrot.slane %v672_v10, %v110_v44 }
 0x1bf   :  { %2109 = vmatprep.subr.bf16.mxu0 %v3009_v15  ;;  %2281 = vmatprep.subr.bf16.mxu1 %v3012_v37  ;;  %p3180_p7 = por %p3179_p6, %p3178_p5 }
 0x1c1   :  { %p3181_p8 = pnand %p3180_p7, %p3174_p4 }
 0x1c2   :  { %2110 = vmatpush1.bf16.msra.mxu0 %v3007_v17  ;;  %2282 = vmatpush1.bf16.msra.mxu1 %v3010_v41 }
 0x1c3   :  { %2111 = vmatprep.subr.bf16.mxu0 %v3015_v18  ;;  %2283 = vmatprep.subr.bf16.mxu1 %v3018_v21 }
 0x1c6   :  { %2112 = vmatpush1.bf16.msra.mxu0 %v3013_v22  ;;  %2284 = vmatpush1.bf16.msra.mxu1 %v3016_v19 }
 0x1c7   :  { %2113 = vmatprep.subr.bf16.mxu0 %v3021_v23  ;;  %2285 = vmatprep.subr.bf16.mxu1 %v3024_v24 }
 0x1ca   :  { %2114 = vmatpush1.bf16.msra.mxu0 %v3019_v25  ;;  %2286 = vmatpush1.bf16.msra.mxu1 %v3022_v26 }
 0x1cb   :  { %2115 = vmatprep.subr.bf16.mxu0 %v3027_v27  ;;  %2287 = vmatprep.subr.bf16.mxu1 %v3030_v28 }
 0x1ce   :  { %2116 = vmatpush1.bf16.msra.mxu0 %v3025_v29  ;;  %2288 = vmatpush1.bf16.msra.mxu1 %v3028_v30 }
 0x1cf   :  { %2117 = vmatprep.subr.bf16.mxu0 %v3033_v31  ;;  %2289 = vmatprep.subr.bf16.mxu1 %v3036_v32 }
 0x1d2   :  { %2118 = vmatpush1.bf16.msra.mxu0 %v3031_v33  ;;  %2290 = vmatpush1.bf16.msra.mxu1 %v3034_v34 }
 0x1d3   :  { %2119 = vmatprep.subr.bf16.mxu0 %v3039_v35  ;;  %2291 = vmatprep.subr.bf16.mxu1 %v3042_v36 }
 0x1d6   :  { %2120 = vmatpush1.bf16.msra.mxu0 %v3037_v38  ;;  %2292 = vmatpush1.bf16.msra.mxu1 %v3040_v45 }
 0x1d7   :  { %2121 = vmatprep.subr.bf16.mxu0 %v3045_v47  ;;  %2293 = vmatprep.subr.bf16.mxu1 %v3048_v48 }
 0x1da   :  { %2122 = vmatpush1.bf16.msra.mxu0 %v3043_v49  ;;  %2294 = vmatpush1.bf16.msra.mxu1 %v3046_v50 }
 0x1db   :  { %2123 = vmatprep.subr.bf16.mxu0 %v3051_v51  ;;  %2295 = vmatprep.subr.bf16.mxu1 %v3054_v52 }
 0x1de   :  { %2124 = vmatpush1.bf16.msra.mxu0 %v3049_v53  ;;  %2296 = vmatpush1.bf16.msra.mxu1 %v3052_v54 }
 0x1df   :  { %2125 = vmatprep.subr.bf16.mxu0 %v3057_v55  ;;  %2297 = vmatprep.subr.bf16.mxu1 %v3060_v56 }
 0x1e2   :  { %2126 = vmatpush1.bf16.msra.mxu0 %v3055_v57  ;;  %2298 = vmatpush1.bf16.msra.mxu1 %v3058_v58 }
 0x1e3   :  { %2127 = vmatprep.subr.bf16.mxu0 %v3063_v59  ;;  %2299 = vmatprep.subr.bf16.mxu1 %v3066_v60 }
 0x1e6   :  { %2128 = vmatpush1.bf16.msra.mxu0 %v3061_v61  ;;  %2300 = vmatpush1.bf16.msra.mxu1 %v3064_v62 }
 0x1e7   :  { %2129 = vmatprep.subr.bf16.mxu0 %v3069_v63  ;;  %2301 = vmatprep.subr.bf16.mxu1 %v3072_v0 }
 0x1ea   :  { %2130 = vmatpush1.bf16.msra.mxu0 %v3067_v1  ;;  %2302 = vmatpush1.bf16.msra.mxu1 %v3070_v2 }
 0x1eb   :  { %2131 = vmatprep.subr.bf16.mxu0 %v3075_v3  ;;  %2303 = vmatprep.subr.bf16.mxu1 %v3078_v4 }
 0x1ee   :  { %2132 = vmatpush1.bf16.msra.mxu0 %v3073_v5  ;;  %2304 = vmatpush1.bf16.msra.mxu1 %v3076_v6 }
 0x1ef   :  { %2133 = vmatprep.subr.bf16.mxu0 %v3081_v7  ;;  %2305 = vmatprep.subr.bf16.mxu1 %v3084_v8 }
 0x1f2   :  { %2134 = vmatpush1.bf16.msra.mxu0 %v3079_v9  ;;  %2306 = vmatpush1.bf16.msra.mxu1 %v3082_v20 }
 0x1f5   :  { %2136 = vmatmul.mubr.bf16.vlgmr.msra.gmra.mrb[8].mxu0 %v3341_v16  ;;  %2308 = vmatmul.mubr.bf16.vlgmr.msra.gmra.mrb[8].mxu1 %v3341_v16 }
 0x2c8   :  { %v2137_v46 = vpop.f32.mrb[8].mxu0  ;;  %v2309_v15 = vpop.f32.mrb[8].mxu1 }
 0x2c9   :  { %v2657_v37 = vadd.f32 %v2137_v46, %v677_v11  ;;  %v2661_v16 = vadd.f32 %v2309_v15, %v685_v12  ;;  %v2139_v17 = vpop.f32.mrb[9].mxu0  ;;  %v2311_v41 = vpop.f32.mrb[9].mxu1 }
 0x2ca   :  { %v2658_v18 = vadd.f32 %v2139_v17, %v681_v13  ;;  %v2662_v21 = vadd.f32 %v2311_v41, %v689_v14  ;;  %v2141_v22 = vpop.f32.mrb[10].mxu0  ;;  %v2313_v19 = vpop.f32.mrb[10].mxu1 }
 0x2cb   :  { %v2318_v40 = vmax.f32 %v2657_v37, 0.0  ;;  %v2320_v23 = vmax.f32 %v2661_v16, 0.0  ;;  %v2659_v24 = vadd.f32 %v2141_v22, %v677_v11  ;;  %v2663_v43 = vadd.f32 %v2313_v19, %v685_v12  ;;  %v2143_v25 = vpop.f32.mrb[11].mxu0  ;;  %v2315_v26 = vpop.f32.mrb[11].mxu1 }
 0x2cc   :  { %v2319_v42 = vmax.f32 %v2658_v18, 0.0  ;;  %v2321_v27 = vmax.f32 %v2662_v21, 0.0  ;;  %v2660_v39 = vadd.f32 %v2143_v25, %v681_v13  ;;  %v2664_v44 = vadd.f32 %v2315_v26, %v689_v14 }
 0x2cd   :  { %v2322_v28 = vmax.f32 %v2659_v24, 0.0  ;;  %v2324_v29 = vmax.f32 %v2663_v43, 0.0 }
 0x2ce   :  { %v2653_v30 = vpack.c.bf16 %v2319_v42, %v2318_v40  ;;  %v2654_v31 = vpack.c.bf16 %v2321_v27, %v2320_v23  ;;  %v2323_v32 = vmax.f32 %v2660_v39, 0.0  ;;  %v2325_v33 = vmax.f32 %v2664_v44, 0.0 }
 0x2d0   :  { %2350 = vst [vmem:[#allocation10] sm:$0xff] %v2653_v30  ;;  %2351 = vst [vmem:[#allocation10 + $0x8] sm:$0xff] %v2654_v31  ;;  %v2655_v34 = vpack.c.bf16 %v2323_v32, %v2322_v28  ;;  %v2656_v35 = vpack.c.bf16 %v2325_v33, %v2324_v29 }
 0x2d2   :  { %2352 = vst [vmem:[#allocation10 + $0x10] sm:$0xff] %v2655_v34  ;;  %2353 = vst [vmem:[#allocation10 + $0x18] sm:$0xff] %v2656_v35 }
 0x2d3   :  { %3184 = shalt.err (!%p3181_p8)
}
 0x2d4   :  { %s3185_s23 = scalar_lea.hbm %s3386_s5, 512 }
 0x2d5   :  { %p3186_p9 = scmp.ne.s32.totalorder %s3386_s5, %s3185_s23  ;;  %p3189_p10 = scmp.lt.u32.totalorder %s3185_s23, %s3386_s5 }
 0x2d7   :  { %p3191_p11 = pnand %p3189_p10, %p3186_p9 }
 0x2d9   :  { %3194 = shalt.err (!%p3191_p11)
}
 0x2da   :  { %2365 = dma.vmem_to_hbm [thread:$0]  %s2360_s19, 512, %s3386_s5, [#allocation4], %s3211_s2, %s3211_s2, %s3212_s16  }
 0x2db   :  { %3201 = dma.done.wait [#allocation4], 512  }
 0x2dc   :  { %3202 = vsyncadd [#allocation4], 4294966784 }
 0x2dd   :  { %2369 = vsyncpa [#allocation3], 1 }
 0x2de   :  { %2370 = vsyncpa [#allocation6], 1 }
 0x2df   :  { %2371 = vsyncpa [#allocation9], 1 }
 0x2e0   :  { %2372 = vsyncpa [#allocation4], 1 }

</bundles_post_ra>
